<compile_context>
chip_gen: v6e
topology: v6e:2x2x1
jax: 0.10.0
libtpu: 0.0.40
codegen_flags: <defaults>
</compile_context>

<pallas_src>
import functools

import jax
import jax.numpy as jnp
from jax import lax
from jax.experimental import pallas as pl
from jax.experimental.pallas import tpu as pltpu


def _contrastive_loss_kernel(temp_ref, emb_i_ref, emb_j_ref, out_ref, *,
                             batch_size, block_rows):
    t = pl.program_id(0)
    inv_temp = 1.0 / temp_ref[0]

    zi = emb_i_ref[...].astype(jnp.float32)   # (block_rows, D)
    zj = emb_j_ref[...].astype(jnp.float32)   # (block_rows, D)

    # The only full-tile VPU work: three raw row sums (3 passes over the tile).
    s_ii = jnp.sum(zi * zi, axis=1, keepdims=True)   # (rows, 1)
    s_jj = jnp.sum(zj * zj, axis=1, keepdims=True)   # (rows, 1)
    s_ij = jnp.sum(zi * zj, axis=1, keepdims=True)   # (rows, 1)

    # Everything below is (rows, 1) scalar-per-row math.
    ni = jnp.sqrt(s_ii)
    nj = jnp.sqrt(s_jj)
    ni_c = jnp.maximum(ni, 1e-12)                    # F.normalize eps
    nj_c = jnp.maximum(nj, 1e-12)
    zni = ni / ni_c                                  # ||z_i[k]||  (~1 unless row ~ 0)
    znj = nj / nj_c                                  # ||z_j[k]||

    # F.cosine_similarity semantics: dot / max(||a|| * ||b||, 1e-8)
    pos    = (s_ij / (ni_c * nj_c)) / jnp.maximum(zni * znj, 1e-8)   # sim[k, k+B]
    diag_i = (s_ii / (ni_c * ni_c)) / jnp.maximum(zni * zni, 1e-8)   # sim[k, k],     k <  B
    diag_j = (s_jj / (nj_c * nj_c)) / jnp.maximum(znj * znj, 1e-8)   # sim[B+k, B+k], k >= B

    # loss_partial[k] + loss_partial[k+B]
    #   = -log(exp(pos/T)/exp(diag_i/T)) - log(exp(pos/T)/exp(diag_j/T))
    #   = (diag_i + diag_j - 2*pos) / T            (log-space, overflow-safe)
    lp = (diag_i + diag_j - 2.0 * pos) * inv_temp

    # Mask rows of a ragged last tile (padded block reads are undefined).
    # Keep this a select (jnp.where), not a multiply-by-mask, so garbage padding
    # (possibly NaN/Inf) is discarded rather than propagated.
    row_ids = t * block_rows + lax.broadcasted_iota(jnp.int32, (block_rows, 1), 0)
    valid = row_ids < batch_size
    tile_sum = jnp.sum(jnp.where(valid, lp, 0.0))

    # Per-tile partial sum -> own (1, 8, 128) output block (lane/sublane aligned).
    # All 1024 elements carry the same value; the wrapper reads [:, 0, 0].
    out_ref[...] = jnp.broadcast_to(tile_sum, (1, 8, 128)).astype(jnp.float32)


def contrastive_loss(emb_i, emb_j, temperature=1.0, *, batch_size=None,
                     target_tile_bytes=2 << 20):
    """emb_i, emb_j: (batch_size, D) arrays (f32 or bf16). Returns scalar f32 loss."""
    B, D = emb_i.shape
    if batch_size is None:
        batch_size = B
    assert B == batch_size and emb_j.shape == (B, D)

    itemsize = jnp.dtype(emb_i.dtype).itemsize
    # Sublane multiple for the input dtype: f32 -> 8, bf16 -> 16, int8/fp8 -> 32.
    sublane = max(8, 32 // itemsize)

    # Byte-budgeted row tiling (~target_tile_bytes per input tile).
    row_bytes = D * itemsize
    if B * row_bytes <= target_tile_bytes:
        block_rows = B                      # whole batch in one tile (full-dim block)
    else:
        block_rows = max((target_tile_bytes // row_bytes) // sublane * sublane,
                         sublane)
        block_rows = min(block_rows, B)
    num_tiles = pl.cdiv(B, block_rows)

    # 2 inputs x 2 buffers x tile, plus slack; safe on v5e/v6e/v7x.
    vmem_limit = int(min(max(4 * block_rows * row_bytes + (2 << 20), 16 << 20),
                         40 << 20))

    temp = jnp.asarray([temperature], dtype=jnp.float32)
    kernel = functools.partial(_contrastive_loss_kernel,
                               batch_size=B, block_rows=block_rows)

    partials = pl.pallas_call(
        kernel,
        out_shape=jax.ShapeDtypeStruct((num_tiles, 8, 128), jnp.float32),
        grid_spec=pltpu.PrefetchScalarGridSpec(
            num_scalar_prefetch=0,
            grid=(num_tiles,),
            in_specs=[
                pl.BlockSpec(memory_space=pltpu.MemorySpace.SMEM),   # temperature
                pl.BlockSpec((block_rows, D), lambda t: (t, 0)),     # emb_i tile
                pl.BlockSpec((block_rows, D), lambda t: (t, 0)),     # emb_j tile
            ],
            out_specs=pl.BlockSpec((1, 8, 128), lambda t: (t, 0, 0)),  # per-tile sum
        ),
        # Each grid step owns a disjoint output block -> row axis is truly
        # parallel (both TensorCores on v7x stream disjoint row tiles).
        compiler_params=pltpu.CompilerParams(
            dimension_semantics=("parallel",),
            vmem_limit_bytes=vmem_limit),
    )(temp, emb_i, emb_j)

    return jnp.sum(partials[:, 0, 0]) / (2.0 * B)


def _reference_loss(emb_i, emb_j, temperature, batch_size):
    """Pure-JAX reference mirroring the PyTorch forward (for sanity check)."""
    def norm(x):
        return x / jnp.maximum(jnp.linalg.norm(x, axis=1, keepdims=True), 1e-12)
    rep = jnp.concatenate([norm(emb_i), norm(emb_j)], axis=0).astype(jnp.float32)
    dots = rep @ rep.T
    n = jnp.linalg.norm(rep, axis=1, keepdims=True)
    sim = dots / jnp.maximum(n @ n.T, 1e-8)
    B = batch_size
    sim_ij = jnp.diagonal(sim, offset=B)
    sim_ji = jnp.diagonal(sim, offset=-B)
    positives = jnp.concatenate([sim_ij, sim_ji])
    nominator = jnp.exp(positives / temperature)
    denominator = jnp.eye(2 * B) * jnp.exp(sim / temperature)
    loss_partial = -jnp.log(nominator / jnp.sum(denominator, axis=1))
    return jnp.sum(loss_partial) / (2 * B)


if __name__ == "__main__":
    key = jax.random.PRNGKey(0)

    # Case 1: module-scale shapes (batch=2, hidden=32), whole batch in one tile.
    batch_size, hidden, temperature = 2, 32, 1.0
    k1, k2, k3, k4 = jax.random.split(key, 4)
    emb_i = jax.random.normal(k1, (batch_size, hidden), dtype=jnp.float32)
    emb_j = jax.random.normal(k2, (batch_size, hidden), dtype=jnp.float32)

    loss = contrastive_loss(emb_i, emb_j, temperature, batch_size=batch_size)
    jax.block_until_ready(loss)
    ref = _reference_loss(emb_i, emb_j, temperature, batch_size)
    assert jnp.allclose(loss, ref, atol=1e-5, rtol=1e-5), (loss, ref)

    # Case 2: force multi-tile + ragged last tile (exercises the parallel grid,
    # the per-tile partial sums, and the row mask) with a tiny byte budget.
    B2, D2, T2 = 20, 128, 0.5
    emb_i2 = jax.random.normal(k3, (B2, D2), dtype=jnp.float32)
    emb_j2 = jax.random.normal(k4, (B2, D2), dtype=jnp.float32)
    loss2 = contrastive_loss(emb_i2, emb_j2, T2, batch_size=B2,
                             target_tile_bytes=4096)
    jax.block_until_ready(loss2)
    ref2 = _reference_loss(emb_i2, emb_j2, T2, B2)
    assert jnp.allclose(loss2, ref2, atol=1e-5, rtol=1e-5), (loss2, ref2)

    print("KERNEL_OK")
</pallas_src>

<mosaic_0001>
module attributes {stable_mosaic.version = 11 : i64} {
  func.func @_contrastive_loss_kernel(%arg0: i32, %arg1: memref<1xf32, #tpu.memory_space<smem>>, %arg2: memref<2x32xf32, #tpu.memory_space<vmem>>, %arg3: memref<2x32xf32, #tpu.memory_space<vmem>>, %arg4: memref<1x8x128xf32, #tpu.memory_space<vmem>>) attributes {dimension_semantics = [#tpu.dimension_semantics<parallel>], iteration_bounds = array<i64: 1>, scalar_prefetch = 0 : i64, scratch_operands = 0 : i64, tpu.core_type = #tpu.core_type<tc>, window_params = [{transform_indices = @transform_0, window_bounds = array<i64: 1>}, {transform_indices = @transform_1, window_bounds = array<i64: 2, 32>}, {transform_indices = @transform_2, window_bounds = array<i64: 2, 32>}, {transform_indices = @transform_3, window_bounds = array<i64: 1, 8, 128>}]} {
    %c0 = arith.constant 0 : index
    %0 = memref.load %arg1[%c0] : memref<1xf32, #tpu.memory_space<smem>>
    %cst = arith.constant 1.000000e+00 : f32
    %1 = arith.divf %cst, %0 : f32
    %c0_0 = arith.constant 0 : index
    %c0_1 = arith.constant 0 : index
    %2 = vector.load %arg2[%c0_0, %c0_1] : memref<2x32xf32, #tpu.memory_space<vmem>>, vector<2x32xf32>
    %c0_2 = arith.constant 0 : index
    %c0_3 = arith.constant 0 : index
    %3 = vector.load %arg3[%c0_2, %c0_3] : memref<2x32xf32, #tpu.memory_space<vmem>>, vector<2x32xf32>
    %4 = arith.mulf %2, %2 : vector<2x32xf32>
    %cst_4 = arith.constant dense<0.000000e+00> : vector<2xf32>
    %5 = vector.multi_reduction <add>, %4, %cst_4 [1] : vector<2x32xf32> to vector<2xf32>
    %6 = vector.shape_cast %5 : vector<2xf32> to vector<2x1xf32>
    %7 = arith.mulf %3, %3 : vector<2x32xf32>
    %cst_5 = arith.constant dense<0.000000e+00> : vector<2xf32>
    %8 = vector.multi_reduction <add>, %7, %cst_5 [1] : vector<2x32xf32> to vector<2xf32>
    %9 = vector.shape_cast %8 : vector<2xf32> to vector<2x1xf32>
    %10 = arith.mulf %2, %3 : vector<2x32xf32>
    %cst_6 = arith.constant dense<0.000000e+00> : vector<2xf32>
    %11 = vector.multi_reduction <add>, %10, %cst_6 [1] : vector<2x32xf32> to vector<2xf32>
    %12 = vector.shape_cast %11 : vector<2xf32> to vector<2x1xf32>
    %13 = math.sqrt %6 : vector<2x1xf32>
    %14 = math.sqrt %9 : vector<2x1xf32>
    %cst_7 = arith.constant 9.99999996E-13 : f32
    %15 = vector.broadcast %cst_7 : f32 to vector<2x1xf32>
    %16 = arith.maximumf %13, %15 : vector<2x1xf32>
    %cst_8 = arith.constant 9.99999996E-13 : f32
    %17 = vector.broadcast %cst_8 : f32 to vector<2x1xf32>
    %18 = arith.maximumf %14, %17 : vector<2x1xf32>
    %19 = arith.divf %13, %16 : vector<2x1xf32>
    %20 = arith.divf %14, %18 : vector<2x1xf32>
    %21 = arith.mulf %16, %18 : vector<2x1xf32>
    %22 = arith.divf %12, %21 : vector<2x1xf32>
    %23 = arith.mulf %19, %20 : vector<2x1xf32>
    %cst_9 = arith.constant 9.99999993E-9 : f32
    %24 = vector.broadcast %cst_9 : f32 to vector<2x1xf32>
    %25 = arith.maximumf %23, %24 : vector<2x1xf32>
    %26 = arith.divf %22, %25 : vector<2x1xf32>
    %27 = arith.mulf %16, %16 : vector<2x1xf32>
    %28 = arith.divf %6, %27 : vector<2x1xf32>
    %29 = arith.mulf %19, %19 : vector<2x1xf32>
    %cst_10 = arith.constant 9.99999993E-9 : f32
    %30 = vector.broadcast %cst_10 : f32 to vector<2x1xf32>
    %31 = arith.maximumf %29, %30 : vector<2x1xf32>
    %32 = arith.divf %28, %31 : vector<2x1xf32>
    %33 = arith.mulf %18, %18 : vector<2x1xf32>
    %34 = arith.divf %9, %33 : vector<2x1xf32>
    %35 = arith.mulf %20, %20 : vector<2x1xf32>
    %cst_11 = arith.constant 9.99999993E-9 : f32
    %36 = vector.broadcast %cst_11 : f32 to vector<2x1xf32>
    %37 = arith.maximumf %35, %36 : vector<2x1xf32>
    %38 = arith.divf %34, %37 : vector<2x1xf32>
    %39 = arith.addf %32, %38 : vector<2x1xf32>
    %cst_12 = arith.constant 2.000000e+00 : f32
    %40 = vector.broadcast %cst_12 : f32 to vector<2x1xf32>
    %41 = arith.mulf %40, %26 : vector<2x1xf32>
    %42 = arith.subf %39, %41 : vector<2x1xf32>
    %43 = vector.broadcast %1 : f32 to vector<2x1xf32>
    %44 = arith.mulf %42, %43 : vector<2x1xf32>
    %c2_i32 = arith.constant 2 : i32
    %45 = arith.muli %arg0, %c2_i32 : i32
    %46 = tpu.iota {dimensions = array<i32: 0>} : vector<2x1xi32>
    %47 = vector.broadcast %45 : i32 to vector<2x1xi32>
    %48 = arith.addi %47, %46 : vector<2x1xi32>
    %c2_i32_13 = arith.constant 2 : i32
    %49 = vector.broadcast %c2_i32_13 : i32 to vector<2x1xi32>
    %50 = arith.cmpi slt, %48, %49 : vector<2x1xi32>
    %cst_14 = arith.constant 0.000000e+00 : f32
    %51 = vector.broadcast %cst_14 : f32 to vector<2x1xf32>
    %52 = arith.select %50, %44, %51 : vector<2x1xi1>, vector<2x1xf32>
    %53 = vector.shape_cast %52 : vector<2x1xf32> to vector<1x2x1xf32>
    %cst_15 = arith.constant dense<0.000000e+00> : vector<1xf32>
    %54 = vector.multi_reduction <add>, %53, %cst_15 [1, 2] : vector<1x2x1xf32> to vector<1xf32>
    %55 = vector.shape_cast %54 : vector<1xf32> to vector<1x1x1xf32>
    %56 = vector.extract %55[0, 0, 0] : f32 from vector<1x1x1xf32>
    %57 = vector.broadcast %56 : f32 to vector<1x8x128xf32>
    %c0_16 = arith.constant 0 : index
    %c0_17 = arith.constant 0 : index
    %c0_18 = arith.constant 0 : index
    %58 = vector.load %arg4[%c0_16, %c0_17, %c0_18] : memref<1x8x128xf32, #tpu.memory_space<vmem>>, vector<1x8x128xf32>
    tpu.vector_store %arg4[%c0_16, %c0_17, %c0_18], %57 {strides = array<i32>} : memref<1x8x128xf32, #tpu.memory_space<vmem>>, vector<1x8x128xf32>,
    return
  }
  func.func @transform_0(%arg0: i32) -> i32 {
    %c0_i32 = arith.constant 0 : i32
    %c0_i32_0 = arith.constant 0 : i32
    return %c0_i32 : i32
  }
  func.func @transform_1(%arg0: i32) -> (i32, i32) {
    %c0_i32 = arith.constant 0 : i32
    %c0_i32_0 = arith.constant 0 : i32
    return %arg0, %c0_i32 : i32, i32
  }
  func.func @transform_2(%arg0: i32) -> (i32, i32) {
    %c0_i32 = arith.constant 0 : i32
    %c0_i32_0 = arith.constant 0 : i32
    return %arg0, %c0_i32 : i32, i32
  }
  func.func @transform_3(%arg0: i32) -> (i32, i32, i32) {
    %c0_i32 = arith.constant 0 : i32
    %c0_i32_0 = arith.constant 0 : i32
    %c0_i32_1 = arith.constant 0 : i32
    return %arg0, %c0_i32, %c0_i32_0 : i32, i32, i32
  }
}

</mosaic_0001>

<bundles_post_ra>
// kernel: tpu_custom_call.1
= control target key start
LH: loop header
LB: loop body
LE: loop exit
PB: predicated region body
PF: predicated region fallthrough
CT: control target
= control target key end

     0   :  { %9 = vsyncpa [#allocation4], 0  ;;  %s234_s0 = inlined_call_operand.<no memory space> [shape: f32[1], index: 0, kind: input, shape index: {}]   ;;  %s235_s1 = inlined_call_operand.vmem [shape: f32[2,32], index: 1, kind: input, shape index: {}]   ;;  %s236_s2 = inlined_call_operand.hbm [shape: f32[2,32], index: 2, kind: input, shape index: {}]   ;;  %s237_s3 = inlined_call_operand.hbm [shape: f32[1,8,128], index: 3, kind: output, shape index: {}]  }
   0x1   :  { %10 = vsyncpa [#allocation5], 0  ;;  %s200_s12 = smov [#allocation3]  }
   0x2   :  { %s21_s13 = sshll.u32 %s200_s12, 4  ;;  %s22_s13 = int_to_ptr.vmem [resolvable:$true] %s21_s13 }
   0x3   :  { %s164_s14 = scalar_lea.vmem %s22_s13, 32  ;;  %p169_p1 = scmp.lt.s32.totalorder %s22_s13, %s22_s13 }
   0x4   :  { %p165_p0 = scmp.ne.s32.totalorder %s22_s13, %s164_s14  ;;  %p170_p2 = scmp.lt.s32.totalorder %s164_s14, %s164_s14 }
   0x6   :  { %p171_p3 = por %p170_p2, %p169_p1 }
   0x8   :  { %p172_p4 = pnand %p171_p3, %p165_p0 }
   0xa   :  { %175 = shalt.err (!%p172_p4)
}
   0xb   :  { %24 = dma.hbm_to_vmem [thread:$0]  %s236_s2, 32, %s22_s13, [#allocation4]  }
   0xc   :  { %196 = dma.done.wait [#allocation4], 32  }
   0xd   :  { %197 = vsyncadd [#allocation4], 4294967264  ;;  %v32_v0 = vld [vmem:[%s235_s1] sm:$0x3]  ;;  %vm35_vm0 = vcmask 254976   ;;  %v29_v8 = vstv %s234_s0  ;;  %v94_v44 = vlaneseq  ;;  %vm100_vm6 = vcmask 1024  }
   0xe   :  { %v33_v1 = vld [vmem:[#allocation3] sm:$0x3]  ;;  %v34_v2 = vmul.f32 %v32_v0, %v32_v0  ;;  %134 = vrcp.f32 %v29_v8  ;;  %s201_s1 = smov [#allocation6]  }
   0xf   :  { %v39_v3 = vmul.f32 %v33_v1, %v33_v1  ;;  %v43_v4 = vmul.f32 %v33_v1, %v32_v0  ;;  %v95_v52 = vshrl.u32 %v94_v44, 7  ;;  %s119_s2 = sshll.u32 %s201_s1, 4  ;;  %s120_s2 = int_to_ptr.vmem [resolvable:$true] %s119_s2 }
  0x10   :  { %v36_v5 = vsel %vm35_vm0, %v34_v2, 0.0  ;;  %s176_s22 = scalar_lea.vmem %s120_s2, 128  ;;  %p181_p6 = scmp.lt.s32.totalorder %s120_s2, %s120_s2 }
  0x11   :  { %v44_v6 = vsel %vm35_vm0, %v43_v4, 0.0  ;;  %37 = vadd.xlane.f32.xlu0 %v36_v5  ;;  %v40_v7 = vsel %vm35_vm0, %v39_v3, 0.0  ;;  %vm98_vm5 = vcmp.lt.s32.totalorder %v95_v52, 2  ;;  %p177_p5 = scmp.ne.s32.totalorder %s120_s2, %s176_s22  ;;  %p182_p7 = scmp.lt.s32.totalorder %s176_s22, %s176_s22 }
  0x12   :  { %45 = vadd.xlane.f32.xlu1 %v44_v6 }
  0x13   :  { %p183_p8 = por %p182_p7, %p181_p6 }
  0x15   :  { %41 = vadd.xlane.f32.xlu0 %v40_v7  ;;  %p184_p9 = pnand %p183_p8, %p177_p5 }
  0x1b   :  { %v135_v9 = vpop.eup %134 }
  0x1c   :  { %128 = vpush %v135_v9 }
  0x4d   :  { %s129_s0 = spop %128 }
  0x4e   :  { %v91_v54 = vstv %s129_s0 }
  0x9a   :  { %v38_v10 = vpop.xlane.xlu0 %37 }
  0x9b   :  { %136 = vrsqrt.f32 %v38_v10  ;;  %vm49_vm1 = vcmp.eq.f32.partialorder %v38_v10, inf  ;;  %v52_v14 = vand.u32 2147483648, %v38_v10  ;;  %vm51_vm2 = vcmp.eq.f32.partialorder %v38_v10, 0.0  ;;  %v46_v40 = vpop.xlane.xlu1 %45 }
  0x9e   :  { %v42_v11 = vpop.xlane.xlu0 %41 }
  0x9f   :  { %138 = vrsqrt.f32 %v42_v11  ;;  %vm56_vm3 = vcmp.eq.f32.partialorder %v42_v11, inf  ;;  %v59_v20 = vand.u32 2147483648, %v42_v11  ;;  %vm58_vm4 = vcmp.eq.f32.partialorder %v42_v11, 0.0 }
  0xa8   :  { %v137_v12 = vpop.eup %136 }
  0xa9   :  { %v48_v13 = vmul.f32 %v137_v12, %v38_v10 }
  0xab   :  { %v50_v15 = vsel %vm49_vm1, %v38_v10, %v48_v13 }
  0xac   :  { %v139_v16 = vpop.eup %138  ;;  %v53_v17 = vsel %vm51_vm2, %v52_v14, %v50_v15 }
  0xad   :  { %v61_v18 = vmax.f32 %v53_v17, 1e-12  ;;  %v55_v19 = vmul.f32 %v139_v16, %v42_v11 }
  0xaf   :  { %140 = vrcp.f32 %v61_v18  ;;  %v57_v21 = vsel %vm56_vm3, %v42_v11, %v55_v19  ;;  %v74_v26 = vmul.f32 %v61_v18, %v61_v18 }
  0xb0   :  { %v60_v22 = vsel %vm58_vm4, %v59_v20, %v57_v21 }
  0xb1   :  { %v62_v23 = vmax.f32 %v60_v22, 1e-12 }
  0xb3   :  { %142 = vrcp.f32 %v62_v23  ;;  %v81_v28 = vmul.f32 %v62_v23, %v62_v23  ;;  %v67_v30 = vmul.f32 %v62_v23, %v61_v18 }
  0xb4   :  { %144 = vrcp.f32 %v74_v26 }
  0xb5   :  { %146 = vrcp.f32 %v81_v28 }
  0xb6   :  { %148 = vrcp.f32 %v67_v30 }
  0xbc   :  { %v141_v24 = vpop.eup %140 }
  0xbd   :  { %v64_v25 = vmul.f32 %v141_v24, %v53_v17 }
  0xbf   :  { %v77_v27 = vmul.f32 %v64_v25, %v64_v25 }
  0xc0   :  { %v143_v29 = vpop.eup %142 }
  0xc1   :  { %v78_v31 = vmax.f32 %v77_v27, 1e-08  ;;  %v66_v32 = vmul.f32 %v143_v29, %v60_v22  ;;  %v145_v37 = vpop.eup %144 }
  0xc2   :  { %v147_v38 = vpop.eup %146  ;;  %v76_v42 = vmul.f32 %v145_v37, %v38_v10 }
  0xc3   :  { %v70_v33 = vmul.f32 %v66_v32, %v64_v25  ;;  %v84_v34 = vmul.f32 %v66_v32, %v66_v32  ;;  %150 = vrcp.f32 %v78_v31  ;;  %v149_v39 = vpop.eup %148  ;;  %v83_v43 = vmul.f32 %v147_v38, %v42_v11 }
  0xc4   :  { %v69_v46 = vmul.f32 %v149_v39, %v46_v40 }
  0xc5   :  { %v85_v35 = vmax.f32 %v84_v34, 1e-08  ;;  %v71_v36 = vmax.f32 %v70_v33, 1e-08 }
  0xc7   :  { %152 = vrcp.f32 %v85_v35 }
  0xc8   :  { %154 = vrcp.f32 %v71_v36 }
  0xd0   :  { %v151_v41 = vpop.eup %150 }
  0xd1   :  { %v80_v48 = vmul.f32 %v151_v41, %v76_v42 }
  0xd4   :  { %v153_v45 = vpop.eup %152 }
  0xd5   :  { %v155_v47 = vpop.eup %154  ;;  %v87_v49 = vmul.f32 %v153_v45, %v83_v43 }
  0xd6   :  { %v73_v50 = vmul.f32 %v155_v47, %v69_v46 }
  0xd7   :  { %v88_v51 = vadd.f32 %v87_v49, %v80_v48 }
  0xd8   :  { %v89_v53 = vmul.f32 2.0, %v73_v50 }
  0xda   :  { %v90_v55 = vsub.f32 %v88_v51, %v89_v53 }
  0xdc   :  { %v92_v56 = vmul.f32 %v91_v54, %v90_v55 }
  0xde   :  { %v99_v57 = vsel %vm98_vm5, %v92_v56, 0.0 }
  0xdf   :  { %v101_v58 = vsel %vm100_vm6, %v99_v57, 0.0 }
  0xe0   :  { %102 = vadd.xlane.f32.xlu1 %v101_v58 }
 0x169   :  { %v103_v59 = vpop.xlane.xlu1 %102 }
 0x16a   :  { %v104_v60 = vrot.slane %v103_v59, 4 }
 0x16c   :  { %v105_v61 = vadd.f32 %v104_v60, %v103_v59 }
 0x16e   :  { %v106_v62 = vrot.slane %v105_v61, 2 }
 0x170   :  { %v107_v63 = vadd.f32 %v106_v62, %v105_v61 }
 0x172   :  { %v108_v0 = vrot.slane %v107_v63, 1 }
 0x174   :  { %v109_v1 = vadd.f32 %v108_v0, %v107_v63 }
 0x176   :  { %130 = vpush %v109_v1 }
 0x1a7   :  { %s131_s21 = spop %130 }
 0x1a8   :  { %v111_v2 = vstv %s131_s21 }
 0x1a9   :  { %112 = vst [vmem:[#allocation6] sm:$0xff] %v111_v2 }
 0x1aa   :  { %187 = shalt.err (!%p184_p9)
}
 0x1ab   :  { %122 = dma.vmem_to_hbm [thread:$0]  %s120_s2, 128, %s237_s3, [#allocation5]  }
 0x1ac   :  { %198 = dma.done.wait [#allocation5], 128  }
 0x1ad   :  { %199 = vsyncadd [#allocation5], 4294967168 }
 0x1ae   :  { %126 = vsyncpa [#allocation4], 1 }
 0x1af   :  { %127 = vsyncpa [#allocation5], 1 }

</bundles_post_ra>
